<compile_context>
chip_gen: v6e
topology: v6e:2x2x1
jax: 0.10.0
libtpu: 0.0.40
codegen_flags: <defaults>
</compile_context>

<pallas_src>
import functools

import jax
import jax.numpy as jnp
from jax.experimental import pallas as pl
from jax.experimental.pallas import tpu as pltpu


def _round_up(n, m):
    return ((n + m - 1) // m) * m


def mlp_kernel(x_ref, w1_ref, b1_ref, w2_ref, b2_ref, o_ref):
    # fc1 on the MXU (f32 accumulate); bias add + ReLU on the VPU (free slots).
    h = jnp.dot(x_ref[...], w1_ref[...], preferred_element_type=jnp.float32)
    h = jnp.maximum(h + b1_ref[...], 0.0)
    # fc2 on the MXU; bias add on the VPU; lane-dense unmasked store.
    o_ref[...] = (
        jnp.dot(h, w2_ref[...], preferred_element_type=jnp.float32) + b2_ref[...]
    ).astype(o_ref.dtype)


def prepare_params(w1, b1, w2, b2):
    """One-time (init-time) padding of parameters to lane-dense (8,128) tiles.

    w1: (in, hidden); b1: (hidden,); w2: (hidden, out); b2: (out,)  -- i.e. the
    PyTorch Linear weights stored transposed as (in_features, out_features).
    """
    in_dim, hid_dim = w1.shape
    out_dim = w2.shape[1]
    IN_PAD = max(128, _round_up(in_dim, 128))
    HID_PAD = max(128, _round_up(hid_dim, 128))
    OUT_PAD = max(128, _round_up(out_dim, 128))

    w1_pad = (
        jnp.zeros((IN_PAD, HID_PAD), jnp.float32)
        .at[:in_dim, :hid_dim].set(w1.astype(jnp.float32))
    )
    b1_pad = jnp.zeros((1, HID_PAD), jnp.float32).at[0, :hid_dim].set(
        b1.astype(jnp.float32))
    w2_pad = (
        jnp.zeros((HID_PAD, OUT_PAD), jnp.float32)
        .at[:hid_dim, :out_dim].set(w2.astype(jnp.float32))
    )
    b2_pad = jnp.zeros((1, OUT_PAD), jnp.float32).at[0, :out_dim].set(
        b2.astype(jnp.float32))
    return (w1_pad, b1_pad, w2_pad, b2_pad, (in_dim, hid_dim, out_dim))


@functools.partial(jax.jit, static_argnames=("out_dim",))
def _forward_jit(x, w1_pad, b1_pad, w2_pad, b2_pad, *, out_dim):
    B, in_dim = x.shape
    IN_PAD = w1_pad.shape[0]
    OUT_PAD = w2_pad.shape[1]
    B_PAD = max(8, _round_up(B, 8))

    # Single lane-dense zero-pad of the activations; allow_input_fusion lets
    # this producer fuse straight into the Pallas custom call.
    x_pad = jnp.pad(x.astype(jnp.float32),
                    ((0, B_PAD - B), (0, IN_PAD - in_dim)))

    out_pad = pl.pallas_call(
        mlp_kernel,
        out_shape=jax.ShapeDtypeStruct((B_PAD, OUT_PAD), jnp.float32),
        in_specs=[pl.BlockSpec(memory_space=pltpu.MemorySpace.VMEM)] * 5,
        out_specs=pl.BlockSpec(memory_space=pltpu.MemorySpace.VMEM),
        compiler_params=pltpu.CompilerParams(
            allow_input_fusion=[True, True, True, True, True]),
    )(x_pad, w1_pad, b1_pad, w2_pad, b2_pad)

    # Slice the real (B, out_dim) block back out of the lane-dense output.
    return out_pad[:B, :out_dim]


def simple_model_forward(x, params):
    """relu(x @ w1 + b1) @ w2 + b2  ==  PyTorch fc1 -> ReLU -> fc2."""
    w1_pad, b1_pad, w2_pad, b2_pad, (_, _, out_dim) = params
    return _forward_jit(x, w1_pad, b1_pad, w2_pad, b2_pad, out_dim=out_dim)


if __name__ == "__main__":
    input_dim, hidden_dim, output_dim = 10, 20, 2
    batch = 8

    key = jax.random.PRNGKey(0)
    kx, kw1, kb1, kw2, kb2 = jax.random.split(key, 5)

    # Deterministic synthetic parameters (PyTorch-style uniform init).
    lim1 = 1.0 / jnp.sqrt(jnp.float32(input_dim))
    lim2 = 1.0 / jnp.sqrt(jnp.float32(hidden_dim))
    w1 = jax.random.uniform(kw1, (input_dim, hidden_dim), jnp.float32, -lim1, lim1)
    b1 = jax.random.uniform(kb1, (hidden_dim,), jnp.float32, -lim1, lim1)
    w2 = jax.random.uniform(kw2, (hidden_dim, output_dim), jnp.float32, -lim2, lim2)
    b2 = jax.random.uniform(kb2, (output_dim,), jnp.float32, -lim2, lim2)

    x = jax.random.normal(kx, (batch, input_dim), jnp.float32)

    # Padded/lane-dense parameters are built once (model init), not per call.
    params = prepare_params(w1, b1, w2, b2)

    out = simple_model_forward(x, params)
    out = jax.block_until_ready(out)

    # Pure-JAX reference check of the forward semantics.
    ref = jnp.maximum(x @ w1 + b1, 0.0) @ w2 + b2
    assert out.shape == (batch, output_dim)
    assert jnp.allclose(out, ref, atol=1e-5, rtol=1e-5)

    print("KERNEL_OK")
</pallas_src>

<mosaic_0001>
module attributes {stable_mosaic.version = 11 : i64} {
  func.func @mlp_kernel(%arg0: memref<8x128xf32, #tpu.memory_space<vmem>>, %arg1: memref<128x128xf32, #tpu.memory_space<vmem>>, %arg2: memref<1x128xf32, #tpu.memory_space<vmem>>, %arg3: memref<128x128xf32, #tpu.memory_space<vmem>>, %arg4: memref<1x128xf32, #tpu.memory_space<vmem>>, %arg5: memref<8x128xf32, #tpu.memory_space<vmem>>) attributes {dimension_semantics = [], scalar_prefetch = 0 : i64, scratch_operands = 0 : i64, tpu.core_type = #tpu.core_type<tc>} {
    %c0 = arith.constant 0 : index
    %c0_0 = arith.constant 0 : index
    %0 = vector.load %arg0[%c0, %c0_0] : memref<8x128xf32, #tpu.memory_space<vmem>>, vector<8x128xf32>
    %c0_1 = arith.constant 0 : index
    %c0_2 = arith.constant 0 : index
    %1 = vector.load %arg1[%c0_1, %c0_2] : memref<128x128xf32, #tpu.memory_space<vmem>>, vector<128x128xf32>
    %cst = arith.constant dense<0.000000e+00> : vector<8x128xf32>
    %2 = tpu.matmul %0, %1, %cst {dimension_numbers = #tpu.dot_dimension_numbers<[1], [0], [0], [1], [0, 0, 1, 1], [], []>} : vector<8x128xf32>, vector<128x128xf32>, vector<8x128xf32> -> vector<8x128xf32>
    %c0_3 = arith.constant 0 : index
    %c0_4 = arith.constant 0 : index
    %3 = vector.load %arg2[%c0_3, %c0_4] : memref<1x128xf32, #tpu.memory_space<vmem>>, vector<1x128xf32>
    %4 = vector.broadcast %3 : vector<1x128xf32> to vector<8x128xf32>
    %5 = arith.addf %2, %4 : vector<8x128xf32>
    %cst_5 = arith.constant 0.000000e+00 : f32
    %6 = vector.broadcast %cst_5 : f32 to vector<8x128xf32>
    %7 = arith.maximumf %5, %6 : vector<8x128xf32>
    %c0_6 = arith.constant 0 : index
    %c0_7 = arith.constant 0 : index
    %8 = vector.load %arg3[%c0_6, %c0_7] : memref<128x128xf32, #tpu.memory_space<vmem>>, vector<128x128xf32>
    %cst_8 = arith.constant dense<0.000000e+00> : vector<8x128xf32>
    %9 = tpu.matmul %7, %8, %cst_8 {dimension_numbers = #tpu.dot_dimension_numbers<[1], [0], [0], [1], [0, 0, 1, 1], [], []>} : vector<8x128xf32>, vector<128x128xf32>, vector<8x128xf32> -> vector<8x128xf32>
    %c0_9 = arith.constant 0 : index
    %c0_10 = arith.constant 0 : index
    %10 = vector.load %arg4[%c0_9, %c0_10] : memref<1x128xf32, #tpu.memory_space<vmem>>, vector<1x128xf32>
    %11 = vector.broadcast %10 : vector<1x128xf32> to vector<8x128xf32>
    %12 = arith.addf %9, %11 : vector<8x128xf32>
    %c0_11 = arith.constant 0 : index
    %c0_12 = arith.constant 0 : index
    %13 = vector.load %arg5[%c0_11, %c0_12] : memref<8x128xf32, #tpu.memory_space<vmem>>, vector<8x128xf32>
    tpu.vector_store %arg5[%c0_11, %c0_12], %12 {strides = array<i32>} : memref<8x128xf32, #tpu.memory_space<vmem>>, vector<8x128xf32>,
    return
  }
}

</mosaic_0001>

<bundles_post_ra>
// kernel: _forward_jit.2
= control target key start
LH: loop header
LB: loop body
LE: loop exit
PB: predicated region body
PF: predicated region fallthrough
CT: control target
= control target key end

     0   :  { %s543_s0 = inlined_call_operand.hbm [shape: f32[128,128], index: 0, kind: input, shape index: {}]   ;;  %s544_s1 = inlined_call_operand.vmem [shape: f32[1,128], index: 1, kind: input, shape index: {}]   ;;  %s545_s2 = inlined_call_operand.hbm [shape: f32[128,128], index: 2, kind: input, shape index: {}]   ;;  %s546_s3 = inlined_call_operand.vmem [shape: f32[1,128], index: 3, kind: input, shape index: {}]   ;;  %s547_s4 = inlined_call_operand.hbm [shape: f32[8,10], index: 4, kind: input, shape index: {}]   ;;  %s548_s5 = inlined_call_operand.<no memory space> [shape: f32[], index: 5, kind: input, shape index: {}]   ;;  %s549_s6 = inlined_call_operand.vmem [shape: f32[8,128], index: 6, kind: output, shape index: {}]  }
   0x1   :  { %v11_v0 = vstv %s548_s5 }
   0x2   :  { %12 = vsyncpa [#allocation8], 0 }
   0x3   :  { %13 = vsyncpa [#allocation10], 0  ;;  %s442_s23 = smov [#allocation9]  }
   0x4   :  { %s29_s24 = sshll.u32 %s442_s23, 4  ;;  %s30_s24 = int_to_ptr.vmem [resolvable:$true] %s29_s24 }
   0x5   :  { %s386_s25 = scalar_lea.vmem %s30_s24, 2048  ;;  %p391_p1 = scmp.lt.s32.totalorder %s30_s24, %s30_s24 }
   0x6   :  { %p387_p0 = scmp.ne.s32.totalorder %s30_s24, %s386_s25  ;;  %p392_p2 = scmp.lt.s32.totalorder %s386_s25, %s386_s25 }
   0x8   :  { %p393_p3 = por %p392_p2, %p391_p1 }
   0xa   :  { %p394_p4 = pnand %p393_p3, %p387_p0 }
   0xc   :  { %397 = shalt.err (!%p394_p4)
}
   0xd   :  { %s443_s26 = smov 128   ;;  %s444_s27 = smov 8  }
   0xe   :  { %35 = dma.hbm_to_vmem [thread:$0]  %s543_s0, 2048, %s30_s24, [#allocation10], %s443_s26, %s443_s26, %s444_s27  }
   0xf   :  { %s445_s30 = smov [#allocation7]   ;;  %s446_s8 = smov [#allocation11]  }
  0x10   :  { %s20_s7 = sshll.u32 %s445_s30, 4  ;;  %s43_s9 = sshll.u32 %s446_s8, 4  ;;  %s21_s7 = int_to_ptr.vmem [resolvable:$true] %s20_s7  ;;  %s44_s9 = int_to_ptr.vmem [resolvable:$true] %s43_s9 }
  0x11   :  { %s406_s10 = scalar_lea.vmem %s21_s7, 128  ;;  %p411_p6 = scmp.lt.s32.totalorder %s21_s7, %s21_s7 }
  0x12   :  { %p407_p5 = scmp.ne.s32.totalorder %s21_s7, %s406_s10  ;;  %p412_p7 = scmp.lt.s32.totalorder %s406_s10, %s406_s10 }
  0x14   :  { %p413_p8 = por %p412_p7, %p411_p6 }
  0x16   :  { %p414_p9 = pnand %p413_p8, %p407_p5 }
  0x18   :  { %417 = shalt.err (!%p414_p9)
}
  0x19   :  { %23 = dma.hbm_to_vmem [thread:$0]  %s547_s4, 128, %s21_s7, [#allocation8]  }
  0x1a   :  { %s426_s13 = scalar_lea.vmem %s44_s9, 2048  ;;  %p431_p11 = scmp.lt.s32.totalorder %s44_s9, %s44_s9 }
  0x1b   :  { %p427_p10 = scmp.ne.s32.totalorder %s44_s9, %s426_s13  ;;  %p432_p12 = scmp.lt.s32.totalorder %s426_s13, %s426_s13 }
  0x1d   :  { %p433_p13 = por %p432_p12, %p431_p11 }
  0x1f   :  { %p434_p0 = pnand %p433_p13, %p427_p10 }
  0x21   :  { %437 = shalt.err (!%p434_p0)
}
  0x22   :  { %49 = dma.hbm_to_vmem [thread:$0]  %s545_s2, 2048, %s44_s9, [#allocation10], %s443_s26, %s443_s26, %s444_s27  }
  0x23   :  { %438 = dma.done.wait [#allocation8], 128  }
  0x24   :  { %439 = vsyncadd [#allocation8], 4294967168 }
  0x25   :  { %440 = dma.done.wait [#allocation10], 4096  }
  0x26   :  { %441 = vsyncadd [#allocation10], 4294963200  ;;  %v447_v1 = vmov 0.0   ;;  %vm448_vm0 = vmmov 0   ;;  %v86_v2 = vld [vmem:[#allocation9 + $0x78] sm:$0xff]  ;;  %v85_v3 = vld [vmem:[#allocation9 + $0x70] sm:$0xff]  ;;  %v62_v21 = vlaneseq }
  0x27   :  { %301 = vmatprep.subr.mxu0 %v447_v1  ;;  %333 = vmatprep.mubr.msk.f32.mxu0 %vm448_vm0, %v447_v1  ;;  %v84_v4 = vld [vmem:[#allocation9 + $0x68] sm:$0xff]  ;;  %v83_v5 = vld [vmem:[#allocation9 + $0x60] sm:$0xff]  ;;  %v180_v6 = vld [vmem:[#allocation11 + $0x78] sm:$0xff] }
  0x28   :  { %336 = vmatprep.subr.mxu1 %v447_v1  ;;  %368 = vmatprep.mubr.msk.f32.mxu1 %vm448_vm0, %v447_v1  ;;  %v82_v7 = vld [vmem:[#allocation9 + $0x58] sm:$0xff]  ;;  %v179_v8 = vld [vmem:[#allocation11 + $0x70] sm:$0xff]  ;;  %v178_v9 = vld [vmem:[#allocation11 + $0x68] sm:$0xff]  ;;  %v63_v26 = vand.u32 127, %v62_v21 }
  0x29   :  { %302 = vmatpush3.msra.mxu0 %v86_v2  ;;  %337 = vmatpush3.msra.mxu1 %v180_v6  ;;  %v81_v10 = vld [vmem:[#allocation9 + $0x50] sm:$0xff]  ;;  %v177_v11 = vld [vmem:[#allocation11 + $0x60] sm:$0xff]  ;;  %v80_v12 = vld [vmem:[#allocation9 + $0x48] sm:$0xff] }
  0x2a   :  { %303 = vmatprep.subr.mxu0 %v447_v1  ;;  %338 = vmatprep.subr.mxu1 %v447_v1  ;;  %v176_v13 = vld [vmem:[#allocation11 + $0x58] sm:$0xff]  ;;  %v79_v14 = vld [vmem:[#allocation9 + $0x40] sm:$0xff]  ;;  %v175_v15 = vld [vmem:[#allocation11 + $0x50] sm:$0xff]  ;;  %vm65_vm1 = vcmp.lt.s32.totalorder %v63_v26, 10 }
  0x2b   :  { %304 = vmatpush3.msra.mxu0 %v85_v3  ;;  %339 = vmatpush3.msra.mxu1 %v179_v8  ;;  %v78_v16 = vld [vmem:[#allocation9 + $0x38] sm:$0xff]  ;;  %v174_v17 = vld [vmem:[#allocation11 + $0x48] sm:$0xff]  ;;  %v77_v18 = vld [vmem:[#allocation9 + $0x30] sm:$0xff] }
  0x2c   :  { %305 = vmatprep.subr.mxu0 %v447_v1  ;;  %340 = vmatprep.subr.mxu1 %v447_v1  ;;  %v173_v19 = vld [vmem:[#allocation11 + $0x40] sm:$0xff]  ;;  %v76_v20 = vld [vmem:[#allocation9 + $0x28] sm:$0xff]  ;;  %v172_v22 = vld [vmem:[#allocation11 + $0x38] sm:$0xff] }
  0x2d   :  { %306 = vmatpush3.msra.mxu0 %v84_v4  ;;  %341 = vmatpush3.msra.mxu1 %v178_v9  ;;  %v75_v23 = vld [vmem:[#allocation9 + $0x20] sm:$0xff]  ;;  %v171_v24 = vld [vmem:[#allocation11 + $0x30] sm:$0xff]  ;;  %v74_v25 = vld [vmem:[#allocation9 + $0x18] sm:$0xff] }
  0x2e   :  { %307 = vmatprep.subr.mxu0 %v447_v1  ;;  %342 = vmatprep.subr.mxu1 %v447_v1  ;;  %v170_v27 = vld [vmem:[#allocation11 + $0x28] sm:$0xff]  ;;  %v73_v28 = vld [vmem:[#allocation9 + $0x10] sm:$0xff]  ;;  %v169_v29 = vld [vmem:[#allocation11 + $0x20] sm:$0xff] }
  0x2f   :  { %308 = vmatpush3.msra.mxu0 %v83_v5  ;;  %343 = vmatpush3.msra.mxu1 %v177_v11  ;;  %v72_v30 = vld [vmem:[#allocation9 + $0x8] sm:$0xff]  ;;  %v61_v31 = vld [vmem:[#allocation7] sm:$0xff]  ;;  %v71_v33 = vld [vmem:[#allocation9] sm:$0xff] }
  0x30   :  { %309 = vmatprep.subr.mxu0 %v447_v1  ;;  %344 = vmatprep.subr.mxu1 %v447_v1  ;;  %v168_v32 = vld [vmem:[#allocation11 + $0x18] sm:$0xff]  ;;  %v66_v34 = vsel %vm65_vm1, %v61_v31, %v11_v0  ;;  %v167_v35 = vld [vmem:[#allocation11 + $0x10] sm:$0xff]  ;;  %v166_v36 = vld [vmem:[#allocation11 + $0x8] sm:$0xff] }
  0x31   :  { %310 = vmatpush3.msra.mxu0 %v82_v7  ;;  %345 = vmatpush3.msra.mxu1 %v176_v13  ;;  %v165_v37 = vld [vmem:[#allocation11] sm:$0xff]  ;;  %v265_v38 = vld [vmem:[%s544_s1] ss:$0 sm:$0xff] }
  0x32   :  { %311 = vmatprep.subr.mxu0 %v447_v1  ;;  %346 = vmatprep.subr.mxu1 %v447_v1  ;;  %v266_v43 = vld [vmem:[%s546_s3] ss:$0 sm:$0xff] }
  0x33   :  { %312 = vmatpush3.msra.mxu0 %v81_v10  ;;  %347 = vmatpush3.msra.mxu1 %v175_v15 }
  0x34   :  { %313 = vmatprep.subr.mxu0 %v447_v1  ;;  %348 = vmatprep.subr.mxu1 %v447_v1 }
  0x35   :  { %314 = vmatpush3.msra.mxu0 %v80_v12  ;;  %349 = vmatpush3.msra.mxu1 %v174_v17 }
  0x36   :  { %315 = vmatprep.subr.mxu0 %v447_v1  ;;  %350 = vmatprep.subr.mxu1 %v447_v1 }
  0x37   :  { %316 = vmatpush3.msra.mxu0 %v79_v14  ;;  %351 = vmatpush3.msra.mxu1 %v173_v19 }
  0x38   :  { %317 = vmatprep.subr.mxu0 %v447_v1  ;;  %352 = vmatprep.subr.mxu1 %v447_v1 }
  0x39   :  { %318 = vmatpush3.msra.mxu0 %v78_v16  ;;  %353 = vmatpush3.msra.mxu1 %v172_v22 }
  0x3a   :  { %319 = vmatprep.subr.mxu0 %v447_v1  ;;  %354 = vmatprep.subr.mxu1 %v447_v1 }
  0x3b   :  { %320 = vmatpush3.msra.mxu0 %v77_v18  ;;  %355 = vmatpush3.msra.mxu1 %v171_v24 }
  0x3c   :  { %321 = vmatprep.subr.mxu0 %v447_v1  ;;  %356 = vmatprep.subr.mxu1 %v447_v1 }
  0x3d   :  { %322 = vmatpush3.msra.mxu0 %v76_v20  ;;  %357 = vmatpush3.msra.mxu1 %v170_v27 }
  0x3e   :  { %323 = vmatprep.subr.mxu0 %v447_v1  ;;  %358 = vmatprep.subr.mxu1 %v447_v1 }
  0x3f   :  { %324 = vmatpush3.msra.mxu0 %v75_v23  ;;  %359 = vmatpush3.msra.mxu1 %v169_v29 }
  0x40   :  { %325 = vmatprep.subr.mxu0 %v447_v1  ;;  %360 = vmatprep.subr.mxu1 %v447_v1 }
  0x41   :  { %326 = vmatpush3.msra.mxu0 %v74_v25  ;;  %361 = vmatpush3.msra.mxu1 %v168_v32 }
  0x42   :  { %327 = vmatprep.subr.mxu0 %v447_v1  ;;  %362 = vmatprep.subr.mxu1 %v447_v1 }
  0x43   :  { %328 = vmatpush3.msra.mxu0 %v73_v28  ;;  %363 = vmatpush3.msra.mxu1 %v167_v35 }
  0x44   :  { %329 = vmatprep.subr.mxu0 %v447_v1  ;;  %364 = vmatprep.subr.mxu1 %v447_v1 }
  0x45   :  { %330 = vmatpush3.msra.mxu0 %v72_v30  ;;  %365 = vmatpush3.msra.mxu1 %v166_v36 }
  0x46   :  { %331 = vmatprep.subr.mxu0 %v447_v1  ;;  %366 = vmatprep.subr.mxu1 %v447_v1 }
  0x47   :  { %332 = vmatpush3.msra.mxu0 %v71_v33  ;;  %367 = vmatpush3.msra.mxu1 %v165_v37 }
  0x48   :  { %334 = vmatmul.mubr.f32.vlgmr.msra.gmra.mxu0 %v66_v34 }
 0x108   :  { %v160_v39 = vpop.f32.mrf.mxu0 }
 0x109   :  { %v161_v40 = vadd.f32 %v265_v38, %v160_v39 }
 0x10a   :  { %v335_v41 = vpop.f32.mrf.mxu0 }
 0x10b   :  { %v164_v42 = vmax.f32 %v161_v40, 0.0 }
 0x10d   :  { %369 = vmatmul.mubr.f32.vlgmr.msra.gmra.mxu1 %v164_v42 }
 0x1cd   :  { %v254_v44 = vpop.f32.mrf.mxu1 }
 0x1ce   :  { %v255_v45 = vadd.f32 %v266_v43, %v254_v44 }
 0x1cf   :  { %v370_v46 = vpop.f32.mrf.mxu1 }
 0x1d0   :  { %258 = vst [vmem:[%s549_s6] sm:$0xff] %v255_v45 }
 0x1d1   :  { %263 = vsyncpa [#allocation8], 1 }
 0x1d2   :  { %264 = vsyncpa [#allocation10], 1 }

</bundles_post_ra>
